<compile_context>
chip_gen: v7x
topology: tpu7x:2x2x1
jax: 0.10.0
libtpu: 0.0.40
codegen_flags: <defaults>
</compile_context>

<pallas_src>
import functools

import jax
import jax.numpy as jnp
from jax.experimental import pallas as pl
from jax.experimental.pallas import tpu as pltpu


TM_MAX = 256                      # dst-tile rows (always a multiple of 128)
TK_MAX = 512                      # reduction-tile width over src nodes
HSRC_RESIDENT_BYTES = 8 * 1024 * 1024   # 2 buffers of bf16 h_src must fit this
VMEM_LIMIT_BYTES = 48 * 1024 * 1024     # < 64 MiB physical on v7x


def _round_up(x, m):
    return (x + m - 1) // m * m


def _pad2d(a, rows, cols):
    return jnp.pad(a, ((0, rows - a.shape[0]), (0, cols - a.shape[1])))


# ---------------------------------------------------------------------------
# Kernels
# ---------------------------------------------------------------------------
def _sage_kernel_resident(a_ref, h_ref, ws_ref, wn_ref, b_ref, o_ref, acc_ref,
                          *, tm, tk, apply_relu):
    """h (padded src features) is fully resident in VMEM; sliced with pl.ds."""
    i = pl.program_id(0)
    k = pl.program_id(1)

    @pl.when(k == 0)
    def _():
        acc_ref[...] = jnp.zeros_like(acc_ref)

    # Weighted-mean neighbor aggregation tile: A(tm,tk) @ h_src(tk,d_in)
    ks = pl.multiple_of(k * tk, tk)
    acc_ref[...] += jnp.dot(a_ref[...], h_ref[pl.ds(ks, tk), :],
                            preferred_element_type=jnp.float32)

    @pl.when(k == pl.num_programs(1) - 1)
    def _():
        # dst nodes are the first rows of the src feature matrix (DGL block).
        istart = pl.multiple_of(i * tm, tm)
        h_dst = h_ref[pl.ds(istart, tm), :]
        out = jnp.dot(h_dst, ws_ref[...], preferred_element_type=jnp.float32)
        out += jnp.dot(acc_ref[...].astype(h_dst.dtype), wn_ref[...],
                       preferred_element_type=jnp.float32)
        out += b_ref[...]                       # f32 epilogue
        if apply_relu:
            out = jnp.maximum(out, 0.0)
        o_ref[...] = out.astype(o_ref.dtype)


def _sage_kernel_stream(a_ref, hsrc_ref, hdst_ref, ws_ref, wn_ref, b_ref, o_ref,
                        acc_ref, *, apply_relu):
    """Fallback: h_src streamed tile-by-tile (huge graphs that don't fit VMEM)."""
    k = pl.program_id(1)

    @pl.when(k == 0)
    def _():
        acc_ref[...] = jnp.zeros_like(acc_ref)

    acc_ref[...] += jnp.dot(a_ref[...], hsrc_ref[...],
                            preferred_element_type=jnp.float32)

    @pl.when(k == pl.num_programs(1) - 1)
    def _():
        out = jnp.dot(hdst_ref[...], ws_ref[...],
                      preferred_element_type=jnp.float32)
        out += jnp.dot(acc_ref[...].astype(hdst_ref.dtype), wn_ref[...],
                       preferred_element_type=jnp.float32)
        out += b_ref[...]
        if apply_relu:
            out = jnp.maximum(out, 0.0)
        o_ref[...] = out.astype(o_ref.dtype)


# ---------------------------------------------------------------------------
# One WeightedSAGEConv layer on already-padded operands
# ---------------------------------------------------------------------------
def sage_conv(a_p, h_p, w_self_p, w_neigh_p, b_p, *, apply_relu, out_dtype, tm, tk):
    n_dst_p, n_src_p = a_p.shape
    rows_h, d_in_p = h_p.shape
    d_out_p = w_self_p.shape[1]
    assert n_dst_p % tm == 0 and n_src_p % tk == 0 and rows_h % tk == 0
    assert n_dst_p <= rows_h and n_src_p <= rows_h

    grid = (n_dst_p // tm, n_src_p // tk)
    resident = 2 * rows_h * d_in_p * 2 <= HSRC_RESIDENT_BYTES   # bf16, 2 buffers

    if resident:
        kernel = functools.partial(_sage_kernel_resident, tm=tm, tk=tk,
                                   apply_relu=apply_relu)
        in_specs = [
            pl.BlockSpec((tm, tk), lambda i, k: (i, k)),              # A tile
            pl.BlockSpec((rows_h, d_in_p), lambda i, k: (0, 0)),      # resident h
            pl.BlockSpec((d_in_p, d_out_p), lambda i, k: (0, 0)),     # W_self
            pl.BlockSpec((d_in_p, d_out_p), lambda i, k: (0, 0)),     # W_neigh
            pl.BlockSpec((1, d_out_p), lambda i, k: (0, 0)),          # bias
        ]
        args = (a_p, h_p, w_self_p, w_neigh_p, b_p)
    else:
        kernel = functools.partial(_sage_kernel_stream, apply_relu=apply_relu)
        in_specs = [
            pl.BlockSpec((tm, tk), lambda i, k: (i, k)),              # A tile
            pl.BlockSpec((tk, d_in_p), lambda i, k: (k, 0)),          # h_src tile
            pl.BlockSpec((tm, d_in_p), lambda i, k: (i, 0)),          # h_dst tile
            pl.BlockSpec((d_in_p, d_out_p), lambda i, k: (0, 0)),     # W_self
            pl.BlockSpec((d_in_p, d_out_p), lambda i, k: (0, 0)),     # W_neigh
            pl.BlockSpec((1, d_out_p), lambda i, k: (0, 0)),          # bias
        ]
        args = (a_p, h_p, h_p, w_self_p, w_neigh_p, b_p)   # same array twice

    return pl.pallas_call(
        kernel,
        out_shape=jax.ShapeDtypeStruct((n_dst_p, d_out_p), out_dtype),
        grid=grid,
        in_specs=in_specs,
        out_specs=pl.BlockSpec((tm, d_out_p), lambda i, k: (i, 0)),
        scratch_shapes=[pltpu.VMEM((tm, d_in_p), jnp.float32)],
        compiler_params=pltpu.CompilerParams(
            dimension_semantics=("parallel", "arbitrary"),
            vmem_limit_bytes=VMEM_LIMIT_BYTES),
    )(*args)


# ---------------------------------------------------------------------------
# Static per-layer tiling / padding plan
# ---------------------------------------------------------------------------
def make_plan(block_shapes):
    """block_shapes: list of (n_dst, n_src) per layer. Pure-Python (static)."""
    plans = []
    rows_h = _round_up(block_shapes[0][1], 128)       # padded rows of x
    for n_dst, n_src in block_shapes:
        tm = min(TM_MAX, _round_up(n_dst, 128))
        # keep >=2 dst tiles when possible so both v7x TensorCores get work
        while tm > 128 and _round_up(n_dst, tm) // tm < 2:
            tm //= 2
        n_dst_p = _round_up(n_dst, tm)
        rows_h = max(rows_h, n_dst_p)                 # h must cover dst slices
        tk = min(TK_MAX, rows_h)
        while rows_h % tk:                            # tk must divide rows_h
            tk -= 128
        n_src_p = _round_up(n_src, tk)                # <= rows_h
        plans.append(dict(tm=tm, tk=tk, n_dst=n_dst, n_src=n_src,
                          n_dst_p=n_dst_p, n_src_p=n_src_p, rows_h=rows_h))
        rows_h = n_dst_p                              # next layer's h rows
    return plans


# ---------------------------------------------------------------------------
# One-time preparation (pad + cast); reused across forward calls
# ---------------------------------------------------------------------------
def prepare_params(params):
    prepared = []
    for layer in params["layers"]:
        d_in, d_out = layer["w_self"].shape
        d_in_p, d_out_p = _round_up(d_in, 128), _round_up(d_out, 128)
        prepared.append(dict(
            w_self=_pad2d(layer["w_self"], d_in_p, d_out_p).astype(jnp.bfloat16),
            w_neigh=_pad2d(layer["w_neigh"], d_in_p, d_out_p).astype(jnp.bfloat16),
            b=_pad2d(layer["b"], 1, d_out_p).astype(jnp.float32)))
    return prepared


def prepare_blocks(a_list, plans):
    """Pad + cast the dense weighted-mean aggregation matrices once (bf16)."""
    return [_pad2d(a, p["n_dst_p"], p["n_src_p"]).astype(jnp.bfloat16)
            for a, p in zip(a_list, plans)]


# ---------------------------------------------------------------------------
# Model forward (activations stay padded/bf16 between layers)
# ---------------------------------------------------------------------------
def graphsage_forward(prepared_params, prepared_blocks, x, *, plans, n_classes):
    n_layers = len(prepared_params)
    h = None
    for l, (layer, a_p, p) in enumerate(zip(prepared_params, prepared_blocks, plans)):
        d_in_p = layer["w_self"].shape[0]
        if l == 0:
            h = _pad2d(x, p["rows_h"], d_in_p).astype(jnp.bfloat16)
        elif h.shape[0] < p["rows_h"]:                # rare edge case
            h = jnp.pad(h, ((0, p["rows_h"] - h.shape[0]), (0, 0)))
        last = (l == n_layers - 1)
        h = sage_conv(a_p, h, layer["w_self"], layer["w_neigh"], layer["b"],
                      apply_relu=not last,
                      out_dtype=jnp.float32 if last else jnp.bfloat16,
                      tm=p["tm"], tk=p["tk"])
        # dropout (eval mode) = identity
    return h[:plans[-1]["n_dst"], :n_classes]


def graphsage_reference(params, blocks, x):
    """Pure-JAX f32 reference for validation."""
    h = x
    n_layers = len(params["layers"])
    for l, (layer, a) in enumerate(zip(params["layers"], blocks)):
        n_dst = a.shape[0]
        h_dst = h[:n_dst]
        agg = a @ h
        out = h_dst @ layer["w_self"] + agg @ layer["w_neigh"] + layer["b"]
        if l != n_layers - 1:
            out = jnp.maximum(out, 0.0)
        h = out
    return h


# ---------------------------------------------------------------------------
# Parameter / data construction
# ---------------------------------------------------------------------------
def init_params(key, in_feats, n_hidden, n_classes, n_layers):
    dims = [in_feats] + [n_hidden] * (n_layers - 1) + [n_classes]
    params = {"layers": []}
    for d_in, d_out in zip(dims[:-1], dims[1:]):
        key, k1, k2, k3 = jax.random.split(key, 4)
        params["layers"].append({
            "w_self": jax.random.normal(k1, (d_in, d_out), jnp.float32)
                      * (1.0 / jnp.sqrt(d_in)),
            "w_neigh": jax.random.normal(k2, (d_in, d_out), jnp.float32)
                       * (1.0 / jnp.sqrt(d_in)),
            # b = b_self + b_neigh (both Linear biases folded together)
            "b": jax.random.normal(k3, (1, d_out), jnp.float32) * 0.01,
        })
    return params


def make_block(key, n_dst, n_src):
    """Random bipartite block as a dense weighted-mean aggregation matrix."""
    k_adj, k_w = jax.random.split(key)
    adj = jax.random.bernoulli(k_adj, 0.3, (n_dst, n_src)).astype(jnp.float32)
    # guarantee every dst node has at least one in-edge (dst nodes are the
    # first n_dst src nodes, DGL block convention)
    adj = adj.at[jnp.arange(n_dst), jnp.arange(n_dst)].set(1.0)
    w = jax.random.uniform(k_w, (n_dst, n_src), jnp.float32, 0.5, 1.5)
    deg = jnp.maximum(adj.sum(axis=1, keepdims=True), 1.0)
    return (adj * w) / deg   # h_neigh = A @ h_src == mean_j (w_ij * h_j)


if __name__ == "__main__":
    in_feats, n_hidden, n_classes, n_layers = 16, 32, 8, 2
    n0, n1, n2 = 512, 256, 64   # src nodes per block: block0 512->256, block1 256->64

    key = jax.random.PRNGKey(0)
    key, kx, kb0, kb1 = jax.random.split(key, 4)

    x = jax.random.normal(kx, (n0, in_feats), jnp.float32)
    blocks = [make_block(kb0, n1, n0), make_block(kb1, n2, n1)]
    params = init_params(key, in_feats, n_hidden, n_classes, n_layers)

    plans = make_plan([(b.shape[0], b.shape[1]) for b in blocks])
    prep_params = prepare_params(params)
    prep_blocks = prepare_blocks(blocks, plans)

    fwd = jax.jit(functools.partial(graphsage_forward,
                                    plans=plans, n_classes=n_classes))
    out = jax.block_until_ready(fwd(prep_params, prep_blocks, x))

    assert out.shape == (n2, n_classes), out.shape
    assert jnp.all(jnp.isfinite(out))

    ref = graphsage_reference(params, blocks, x)
    err = float(jnp.max(jnp.abs(out - ref)))
    scale = float(jnp.max(jnp.abs(ref))) + 1e-6
    assert err <= 0.05 * scale + 0.05, (err, scale)   # bf16-matmul tolerance

    print("KERNEL_OK")
</pallas_src>

<mosaic_0001>
module attributes {stable_mosaic.version = 11 : i64} {
  func.func @_sage_kernel_resident(%arg0: i32, %arg1: i32, %arg2: memref<128x512xbf16, #tpu.memory_space<vmem>>, %arg3: memref<512x128xbf16, #tpu.memory_space<vmem>>, %arg4: memref<128x128xbf16, #tpu.memory_space<vmem>>, %arg5: memref<128x128xbf16, #tpu.memory_space<vmem>>, %arg6: memref<1x128xf32, #tpu.memory_space<vmem>>, %arg7: memref<128x128xbf16, #tpu.memory_space<vmem>>, %arg8: memref<128x128xf32, #tpu.memory_space<vmem>>) attributes {dimension_semantics = [#tpu.dimension_semantics<parallel>, #tpu.dimension_semantics<arbitrary>], iteration_bounds = array<i64: 2, 1>, scalar_prefetch = 0 : i64, scratch_operands = 1 : i64, tpu.core_type = #tpu.core_type<tc>, window_params = [{transform_indices = @transform_0, window_bounds = array<i64: 128, 512>}, {pipeline_mode = #tpu.pipeline_mode<synchronous>, transform_indices = @transform_1, window_bounds = array<i64: 512, 128>}, {pipeline_mode = #tpu.pipeline_mode<synchronous>, transform_indices = @transform_2, window_bounds = array<i64: 128, 128>}, {pipeline_mode = #tpu.pipeline_mode<synchronous>, transform_indices = @transform_3, window_bounds = array<i64: 128, 128>}, {pipeline_mode = #tpu.pipeline_mode<synchronous>, transform_indices = @transform_4, window_bounds = array<i64: 1, 128>}, {transform_indices = @transform_5, window_bounds = array<i64: 128, 128>}]} {
    %c0_i32 = arith.constant 0 : i32
    %0 = arith.cmpi eq, %arg1, %c0_i32 : i32
    %1 = arith.extui %0 : i1 to i32
    %c0_i32_0 = arith.constant 0 : i32
    %2 = arith.cmpi ne, %1, %c0_i32_0 : i32
    scf.if %2 {
      %cst_9 = arith.constant 0.000000e+00 : f32
      %15 = vector.broadcast %cst_9 : f32 to vector<128x128xf32>
      %c0_10 = arith.constant 0 : index
      %c0_11 = arith.constant 0 : index
      %16 = vector.load %arg8[%c0_10, %c0_11] : memref<128x128xf32, #tpu.memory_space<vmem>>, vector<128x128xf32>
      tpu.vector_store %arg8[%c0_10, %c0_11], %15 {strides = array<i32>} : memref<128x128xf32, #tpu.memory_space<vmem>>, vector<128x128xf32>,
    } else {
    }
    %c512_i32 = arith.constant 512 : i32
    %3 = arith.muli %arg1, %c512_i32 : i32
    %4 = tpu.assume_multiple %3, 512 : i32
    %c0 = arith.constant 0 : index
    %c0_1 = arith.constant 0 : index
    %5 = vector.load %arg8[%c0, %c0_1] : memref<128x128xf32, #tpu.memory_space<vmem>>, vector<128x128xf32>
    %c0_2 = arith.constant 0 : index
    %c0_3 = arith.constant 0 : index
    %6 = vector.load %arg2[%c0_2, %c0_3] : memref<128x512xbf16, #tpu.memory_space<vmem>>, vector<128x512xbf16>
    %7 = arith.index_cast %4 : i32 to index
    %c0_4 = arith.constant 0 : index
    %8 = vector.load %arg3[%7, %c0_4] : memref<512x128xbf16, #tpu.memory_space<vmem>>, vector<512x128xbf16>
    %cst = arith.constant dense<0.000000e+00> : vector<128x128xf32>
    %9 = tpu.matmul %6, %8, %cst {dimension_numbers = #tpu.dot_dimension_numbers<[1], [0], [0], [1], [0, 0, 1, 1], [], []>} : vector<128x512xbf16>, vector<512x128xbf16>, vector<128x128xf32> -> vector<128x128xf32>
    %10 = arith.addf %5, %9 : vector<128x128xf32>
    %c0_5 = arith.constant 0 : index
    %c0_6 = arith.constant 0 : index
    %11 = vector.load %arg8[%c0_5, %c0_6] : memref<128x128xf32, #tpu.memory_space<vmem>>, vector<128x128xf32>
    tpu.vector_store %arg8[%c0_5, %c0_6], %10 {strides = array<i32>} : memref<128x128xf32, #tpu.memory_space<vmem>>, vector<128x128xf32>,
    %c0_i32_7 = arith.constant 0 : i32
    %12 = arith.cmpi eq, %arg1, %c0_i32_7 : i32
    %13 = arith.extui %12 : i1 to i32
    %c0_i32_8 = arith.constant 0 : i32
    %14 = arith.cmpi ne, %13, %c0_i32_8 : i32
    scf.if %14 {
      %c128_i32 = arith.constant 128 : i32
      %15 = arith.muli %arg0, %c128_i32 : i32
      %16 = tpu.assume_multiple %15, 128 : i32
      %17 = arith.index_cast %16 : i32 to index
      %c0_9 = arith.constant 0 : index
      %18 = vector.load %arg3[%17, %c0_9] : memref<512x128xbf16, #tpu.memory_space<vmem>>, vector<128x128xbf16>
      %c0_10 = arith.constant 0 : index
      %c0_11 = arith.constant 0 : index
      %19 = vector.load %arg4[%c0_10, %c0_11] : memref<128x128xbf16, #tpu.memory_space<vmem>>, vector<128x128xbf16>
      %cst_12 = arith.constant dense<0.000000e+00> : vector<128x128xf32>
      %20 = tpu.matmul %18, %19, %cst_12 {dimension_numbers = #tpu.dot_dimension_numbers<[1], [0], [0], [1], [0, 0, 1, 1], [], []>} : vector<128x128xbf16>, vector<128x128xbf16>, vector<128x128xf32> -> vector<128x128xf32>
      %c0_13 = arith.constant 0 : index
      %c0_14 = arith.constant 0 : index
      %21 = vector.load %arg8[%c0_13, %c0_14] : memref<128x128xf32, #tpu.memory_space<vmem>>, vector<128x128xf32>
      %22 = arith.truncf %21 : vector<128x128xf32> to vector<128x128xbf16>
      %c0_15 = arith.constant 0 : index
      %c0_16 = arith.constant 0 : index
      %23 = vector.load %arg5[%c0_15, %c0_16] : memref<128x128xbf16, #tpu.memory_space<vmem>>, vector<128x128xbf16>
      %cst_17 = arith.constant dense<0.000000e+00> : vector<128x128xf32>
      %24 = tpu.matmul %22, %23, %cst_17 {dimension_numbers = #tpu.dot_dimension_numbers<[1], [0], [0], [1], [0, 0, 1, 1], [], []>} : vector<128x128xbf16>, vector<128x128xbf16>, vector<128x128xf32> -> vector<128x128xf32>
      %25 = arith.addf %20, %24 : vector<128x128xf32>
      %c0_18 = arith.constant 0 : index
      %c0_19 = arith.constant 0 : index
      %26 = vector.load %arg6[%c0_18, %c0_19] : memref<1x128xf32, #tpu.memory_space<vmem>>, vector<1x128xf32>
      %27 = vector.broadcast %26 : vector<1x128xf32> to vector<128x128xf32>
      %28 = arith.addf %25, %27 : vector<128x128xf32>
      %cst_20 = arith.constant 0.000000e+00 : f32
      %29 = vector.broadcast %cst_20 : f32 to vector<128x128xf32>
      %30 = arith.maximumf %28, %29 : vector<128x128xf32>
      %31 = arith.truncf %30 : vector<128x128xf32> to vector<128x128xbf16>
      %c0_21 = arith.constant 0 : index
      %c0_22 = arith.constant 0 : index
      %32 = vector.load %arg7[%c0_21, %c0_22] : memref<128x128xbf16, #tpu.memory_space<vmem>>, vector<128x128xbf16>
      tpu.vector_store %arg7[%c0_21, %c0_22], %31 {strides = array<i32>} : memref<128x128xbf16, #tpu.memory_space<vmem>>, vector<128x128xbf16>,
    } else {
    }
    return
  }
  func.func @transform_0(%arg0: i32, %arg1: i32) -> (i32, i32) {
    %c0_i32 = arith.constant 0 : i32
    return %arg0, %arg1 : i32, i32
  }
  func.func @transform_1(%arg0: i32, %arg1: i32) -> (i32, i32) {
    %c0_i32 = arith.constant 0 : i32
    %c0_i32_0 = arith.constant 0 : i32
    %c0_i32_1 = arith.constant 0 : i32
    return %c0_i32, %c0_i32_0 : i32, i32
  }
  func.func @transform_2(%arg0: i32, %arg1: i32) -> (i32, i32) {
    %c0_i32 = arith.constant 0 : i32
    %c0_i32_0 = arith.constant 0 : i32
    %c0_i32_1 = arith.constant 0 : i32
    return %c0_i32, %c0_i32_0 : i32, i32
  }
  func.func @transform_3(%arg0: i32, %arg1: i32) -> (i32, i32) {
    %c0_i32 = arith.constant 0 : i32
    %c0_i32_0 = arith.constant 0 : i32
    %c0_i32_1 = arith.constant 0 : i32
    return %c0_i32, %c0_i32_0 : i32, i32
  }
  func.func @transform_4(%arg0: i32, %arg1: i32) -> (i32, i32) {
    %c0_i32 = arith.constant 0 : i32
    %c0_i32_0 = arith.constant 0 : i32
    %c0_i32_1 = arith.constant 0 : i32
    return %c0_i32, %c0_i32_0 : i32, i32
  }
  func.func @transform_5(%arg0: i32, %arg1: i32) -> (i32, i32) {
    %c0_i32 = arith.constant 0 : i32
    %c0_i32_0 = arith.constant 0 : i32
    return %arg0, %c0_i32 : i32, i32
  }
}

module attributes {stable_mosaic.version = 11 : i64} {
  func.func @_sage_kernel_resident(%arg0: i32, %arg1: i32, %arg2: memref<128x256xbf16, #tpu.memory_space<vmem>>, %arg3: memref<256x128xbf16, #tpu.memory_space<vmem>>, %arg4: memref<128x128xbf16, #tpu.memory_space<vmem>>, %arg5: memref<128x128xbf16, #tpu.memory_space<vmem>>, %arg6: memref<1x128xf32, #tpu.memory_space<vmem>>, %arg7: memref<128x128xf32, #tpu.memory_space<vmem>>, %arg8: memref<128x128xf32, #tpu.memory_space<vmem>>) attributes {dimension_semantics = [#tpu.dimension_semantics<parallel>, #tpu.dimension_semantics<arbitrary>], iteration_bounds = array<i64: 1, 1>, scalar_prefetch = 0 : i64, scratch_operands = 1 : i64, tpu.core_type = #tpu.core_type<tc>, window_params = [{transform_indices = @transform_0, window_bounds = array<i64: 128, 256>}, {pipeline_mode = #tpu.pipeline_mode<synchronous>, transform_indices = @transform_1, window_bounds = array<i64: 256, 128>}, {pipeline_mode = #tpu.pipeline_mode<synchronous>, transform_indices = @transform_2, window_bounds = array<i64: 128, 128>}, {pipeline_mode = #tpu.pipeline_mode<synchronous>, transform_indices = @transform_3, window_bounds = array<i64: 128, 128>}, {pipeline_mode = #tpu.pipeline_mode<synchronous>, transform_indices = @transform_4, window_bounds = array<i64: 1, 128>}, {transform_indices = @transform_5, window_bounds = array<i64: 128, 128>}]} {
    %c0_i32 = arith.constant 0 : i32
    %0 = arith.cmpi eq, %arg1, %c0_i32 : i32
    %1 = arith.extui %0 : i1 to i32
    %c0_i32_0 = arith.constant 0 : i32
    %2 = arith.cmpi ne, %1, %c0_i32_0 : i32
    scf.if %2 {
      %cst_9 = arith.constant 0.000000e+00 : f32
      %15 = vector.broadcast %cst_9 : f32 to vector<128x128xf32>
      %c0_10 = arith.constant 0 : index
      %c0_11 = arith.constant 0 : index
      %16 = vector.load %arg8[%c0_10, %c0_11] : memref<128x128xf32, #tpu.memory_space<vmem>>, vector<128x128xf32>
      tpu.vector_store %arg8[%c0_10, %c0_11], %15 {strides = array<i32>} : memref<128x128xf32, #tpu.memory_space<vmem>>, vector<128x128xf32>,
    } else {
    }
    %c256_i32 = arith.constant 256 : i32
    %3 = arith.muli %arg1, %c256_i32 : i32
    %4 = tpu.assume_multiple %3, 256 : i32
    %c0 = arith.constant 0 : index
    %c0_1 = arith.constant 0 : index
    %5 = vector.load %arg8[%c0, %c0_1] : memref<128x128xf32, #tpu.memory_space<vmem>>, vector<128x128xf32>
    %c0_2 = arith.constant 0 : index
    %c0_3 = arith.constant 0 : index
    %6 = vector.load %arg2[%c0_2, %c0_3] : memref<128x256xbf16, #tpu.memory_space<vmem>>, vector<128x256xbf16>
    %7 = arith.index_cast %4 : i32 to index
    %c0_4 = arith.constant 0 : index
    %8 = vector.load %arg3[%7, %c0_4] : memref<256x128xbf16, #tpu.memory_space<vmem>>, vector<256x128xbf16>
    %cst = arith.constant dense<0.000000e+00> : vector<128x128xf32>
    %9 = tpu.matmul %6, %8, %cst {dimension_numbers = #tpu.dot_dimension_numbers<[1], [0], [0], [1], [0, 0, 1, 1], [], []>} : vector<128x256xbf16>, vector<256x128xbf16>, vector<128x128xf32> -> vector<128x128xf32>
    %10 = arith.addf %5, %9 : vector<128x128xf32>
    %c0_5 = arith.constant 0 : index
    %c0_6 = arith.constant 0 : index
    %11 = vector.load %arg8[%c0_5, %c0_6] : memref<128x128xf32, #tpu.memory_space<vmem>>, vector<128x128xf32>
    tpu.vector_store %arg8[%c0_5, %c0_6], %10 {strides = array<i32>} : memref<128x128xf32, #tpu.memory_space<vmem>>, vector<128x128xf32>,
    %c0_i32_7 = arith.constant 0 : i32
    %12 = arith.cmpi eq, %arg1, %c0_i32_7 : i32
    %13 = arith.extui %12 : i1 to i32
    %c0_i32_8 = arith.constant 0 : i32
    %14 = arith.cmpi ne, %13, %c0_i32_8 : i32
    scf.if %14 {
      %c128_i32 = arith.constant 128 : i32
      %15 = arith.muli %arg0, %c128_i32 : i32
      %16 = tpu.assume_multiple %15, 128 : i32
      %17 = arith.index_cast %16 : i32 to index
      %c0_9 = arith.constant 0 : index
      %18 = vector.load %arg3[%17, %c0_9] : memref<256x128xbf16, #tpu.memory_space<vmem>>, vector<128x128xbf16>
      %c0_10 = arith.constant 0 : index
      %c0_11 = arith.constant 0 : index
      %19 = vector.load %arg4[%c0_10, %c0_11] : memref<128x128xbf16, #tpu.memory_space<vmem>>, vector<128x128xbf16>
      %cst_12 = arith.constant dense<0.000000e+00> : vector<128x128xf32>
      %20 = tpu.matmul %18, %19, %cst_12 {dimension_numbers = #tpu.dot_dimension_numbers<[1], [0], [0], [1], [0, 0, 1, 1], [], []>} : vector<128x128xbf16>, vector<128x128xbf16>, vector<128x128xf32> -> vector<128x128xf32>
      %c0_13 = arith.constant 0 : index
      %c0_14 = arith.constant 0 : index
      %21 = vector.load %arg8[%c0_13, %c0_14] : memref<128x128xf32, #tpu.memory_space<vmem>>, vector<128x128xf32>
      %22 = arith.truncf %21 : vector<128x128xf32> to vector<128x128xbf16>
      %c0_15 = arith.constant 0 : index
      %c0_16 = arith.constant 0 : index
      %23 = vector.load %arg5[%c0_15, %c0_16] : memref<128x128xbf16, #tpu.memory_space<vmem>>, vector<128x128xbf16>
      %cst_17 = arith.constant dense<0.000000e+00> : vector<128x128xf32>
      %24 = tpu.matmul %22, %23, %cst_17 {dimension_numbers = #tpu.dot_dimension_numbers<[1], [0], [0], [1], [0, 0, 1, 1], [], []>} : vector<128x128xbf16>, vector<128x128xbf16>, vector<128x128xf32> -> vector<128x128xf32>
      %25 = arith.addf %20, %24 : vector<128x128xf32>
      %c0_18 = arith.constant 0 : index
      %c0_19 = arith.constant 0 : index
      %26 = vector.load %arg6[%c0_18, %c0_19] : memref<1x128xf32, #tpu.memory_space<vmem>>, vector<1x128xf32>
      %27 = vector.broadcast %26 : vector<1x128xf32> to vector<128x128xf32>
      %28 = arith.addf %25, %27 : vector<128x128xf32>
      %c0_20 = arith.constant 0 : index
      %c0_21 = arith.constant 0 : index
      %29 = vector.load %arg7[%c0_20, %c0_21] : memref<128x128xf32, #tpu.memory_space<vmem>>, vector<128x128xf32>
      tpu.vector_store %arg7[%c0_20, %c0_21], %28 {strides = array<i32>} : memref<128x128xf32, #tpu.memory_space<vmem>>, vector<128x128xf32>,
    } else {
    }
    return
  }
  func.func @transform_0(%arg0: i32, %arg1: i32) -> (i32, i32) {
    %c0_i32 = arith.constant 0 : i32
    return %arg0, %arg1 : i32, i32
  }
  func.func @transform_1(%arg0: i32, %arg1: i32) -> (i32, i32) {
    %c0_i32 = arith.constant 0 : i32
    %c0_i32_0 = arith.constant 0 : i32
    %c0_i32_1 = arith.constant 0 : i32
    return %c0_i32, %c0_i32_0 : i32, i32
  }
  func.func @transform_2(%arg0: i32, %arg1: i32) -> (i32, i32) {
    %c0_i32 = arith.constant 0 : i32
    %c0_i32_0 = arith.constant 0 : i32
    %c0_i32_1 = arith.constant 0 : i32
    return %c0_i32, %c0_i32_0 : i32, i32
  }
  func.func @transform_3(%arg0: i32, %arg1: i32) -> (i32, i32) {
    %c0_i32 = arith.constant 0 : i32
    %c0_i32_0 = arith.constant 0 : i32
    %c0_i32_1 = arith.constant 0 : i32
    return %c0_i32, %c0_i32_0 : i32, i32
  }
  func.func @transform_4(%arg0: i32, %arg1: i32) -> (i32, i32) {
    %c0_i32 = arith.constant 0 : i32
    %c0_i32_0 = arith.constant 0 : i32
    %c0_i32_1 = arith.constant 0 : i32
    return %c0_i32, %c0_i32_0 : i32, i32
  }
  func.func @transform_5(%arg0: i32, %arg1: i32) -> (i32, i32) {
    %c0_i32 = arith.constant 0 : i32
    %c0_i32_0 = arith.constant 0 : i32
    return %arg0, %c0_i32 : i32, i32
  }
}

</mosaic_0001>

<bundles_post_ra>
// kernel: graphsage_forward.3
= control target key start
LH: loop header
LB: loop body
LE: loop exit
PB: predicated region body
PF: predicated region fallthrough
CT: control target
= control target key end

     0   :  { %s1426_s1 = inlined_call_operand.vmem [shape: bf16[256,128], index: 1, kind: input, shape index: {}]   ;;  %s1427_s0 = inlined_call_operand.vmem [shape: bf16[128,256], index: 0, kind: input, shape index: {}]   ;;  %s1428_s3 = inlined_call_operand.vmem [shape: bf16[128,128], index: 3, kind: input, shape index: {}]   ;;  %s1429_s2 = inlined_call_operand.vmem [shape: bf16[128,128], index: 2, kind: input, shape index: {}]   ;;  %s1430_s4 = inlined_call_operand.vmem [shape: f32[1,128], index: 4, kind: input, shape index: {}]   ;;  %s1431_s5 = inlined_call_operand.vmem [shape: f32[128,128], index: 5, kind: output, shape index: {}]  }
   0x1   :  { %v1113_v0 = vld [vmem:[%s1426_s1 + $0x40] sm:$0xff]   ;;  %v1115_v2 = vld [vmem:[%s1426_s1 + $0x48] sm:$0xff]   ;;  %v1117_v4 = vld [vmem:[%s1426_s1 + $0x50] sm:$0xff]  }
   0x2   :  { %v1114_v1 = vld [vmem:[%s1426_s1] sm:$0xff]   ;;  %937 = vmatprep.subr.bf16.mxu0 %v1113_v0  ;;  %v1116_v3 = vld [vmem:[%s1426_s1 + $0x8] sm:$0xff]   ;;  %v1118_v5 = vld [vmem:[%s1426_s1 + $0x10] sm:$0xff]  }
   0x3   :  { %938 = vmatpush3.bf16.msra.mxu0 %v1114_v1  ;;  %v1119_v6 = vld [vmem:[%s1426_s1 + $0x58] sm:$0xff]   ;;  %v1121_v8 = vld [vmem:[%s1426_s1 + $0x60] sm:$0xff]   ;;  %v1123_v10 = vld [vmem:[%s1426_s1 + $0x68] sm:$0xff]  }
   0x4   :  { %939 = vmatprep.subr.bf16.mxu0 %v1115_v2  ;;  %v1120_v7 = vld [vmem:[%s1426_s1 + $0x18] sm:$0xff]   ;;  %v1122_v9 = vld [vmem:[%s1426_s1 + $0x20] sm:$0xff]   ;;  %v1124_v12 = vld [vmem:[%s1426_s1 + $0x28] sm:$0xff]  }
   0x5   :  { %v1131_v11 = vld [vmem:[%s1427_s0 + $0x4] ss:$8 sps:$4 sm:$0xff]   ;;  %v1125_v13 = vld [vmem:[%s1426_s1 + $0x70] sm:$0xff]   ;;  %v1127_v15 = vld [vmem:[%s1426_s1 + $0x78] sm:$0xff]  }
   0x6   :  { %318 = vmatprep.mubr.bf16.mxu0 %v1131_v11  ;;  %v1126_v14 = vld [vmem:[%s1426_s1 + $0x30] sm:$0xff]   ;;  %v1128_v16 = vld [vmem:[%s1426_s1 + $0x38] sm:$0xff]   ;;  %v1153_v17 = vld [vmem:[%s1428_s3] sm:$0xff]  }
   0x7   :  { %940 = vmatpush3.bf16.msra.mxu0 %v1116_v3  ;;  %v1129_v18 = vld [vmem:[%s1427_s0] ss:$8 sps:$4 sm:$0xff]   ;;  %v1132_v20 = vld [vmem:[%s1427_s0 + $0x14] ss:$8 sps:$4 sm:$0xff]   ;;  %1033 = vmatprep.subr.bf16.mxu1 %v1153_v17  ;;  %v1134_v23 = vld [vmem:[%s1427_s0 + $0x10] ss:$8 sps:$4 sm:$0xff]  }
   0x8   :  { %941 = vmatprep.subr.bf16.mxu0 %v1117_v4  ;;  %v1154_v19 = vld [vmem:[%s1428_s3 + $0x8] sm:$0xff]   ;;  %1034 = vmatpush3.bf16.msra.mxu1 %v1153_v17  ;;  %v1155_v21 = vld [vmem:[%s1428_s3 + $0x10] sm:$0xff]   ;;  %v1156_v22 = vld [vmem:[%s1428_s3 + $0x18] sm:$0xff]  }
   0x9   :  { %1035 = vmatprep.subr.bf16.mxu1 %v1154_v19  ;;  %v1135_v24 = vld [vmem:[%s1427_s0 + $0x24] ss:$8 sps:$4 sm:$0xff]   ;;  %v1137_v25 = vld [vmem:[%s1427_s0 + $0x20] ss:$8 sps:$4 sm:$0xff]   ;;  %v1138_v26 = vld [vmem:[%s1427_s0 + $0x34] ss:$8 sps:$4 sm:$0xff]  }
   0xa   :  { %v1140_v27 = vld [vmem:[%s1427_s0 + $0x30] ss:$8 sps:$4 sm:$0xff]   ;;  %v1141_v28 = vld [vmem:[%s1427_s0 + $0x44] ss:$8 sps:$4 sm:$0xff]   ;;  %v1143_v29 = vld [vmem:[%s1427_s0 + $0x40] ss:$8 sps:$4 sm:$0xff]  }
   0xb   :  { %942 = vmatpush3.bf16.msra.mxu0 %v1118_v5  ;;  %v1144_v30 = vld [vmem:[%s1427_s0 + $0x54] ss:$8 sps:$4 sm:$0xff]   ;;  %v1146_v31 = vld [vmem:[%s1427_s0 + $0x50] ss:$8 sps:$4 sm:$0xff]   ;;  %v1147_v32 = vld [vmem:[%s1427_s0 + $0x64] ss:$8 sps:$4 sm:$0xff]  }
   0xc   :  { %943 = vmatprep.subr.bf16.mxu0 %v1119_v6  ;;  %1036 = vmatpush3.bf16.msra.mxu1 %v1154_v19  ;;  %v1149_v33 = vld [vmem:[%s1427_s0 + $0x60] ss:$8 sps:$4 sm:$0xff]   ;;  %v1150_v34 = vld [vmem:[%s1427_s0 + $0x74] ss:$8 sps:$4 sm:$0xff]   ;;  %v1152_v35 = vld [vmem:[%s1427_s0 + $0x70] ss:$8 sps:$4 sm:$0xff]  }
   0xd   :  { %1037 = vmatprep.subr.bf16.mxu1 %v1155_v21  ;;  %v1157_v36 = vld [vmem:[%s1428_s3 + $0x20] sm:$0xff]   ;;  %v1158_v37 = vld [vmem:[%s1428_s3 + $0x28] sm:$0xff]   ;;  %v1159_v38 = vld [vmem:[%s1428_s3 + $0x30] sm:$0xff]  }
   0xe   :  { %v1160_v39 = vld [vmem:[%s1428_s3 + $0x38] sm:$0xff]   ;;  %v1161_v40 = vld [vmem:[%s1429_s2] sm:$0xff]   ;;  %v1162_v55 = vld [vmem:[%s1429_s2 + $0x8] sm:$0xff]  }
   0xf   :  { %944 = vmatpush3.bf16.msra.mxu0 %v1120_v7  ;;  %v1163_v60 = vld [vmem:[%s1429_s2 + $0x10] sm:$0xff]   ;;  %v1164_v0 = vld [vmem:[%s1429_s2 + $0x18] sm:$0xff]   ;;  %v1165_v5 = vld [vmem:[%s1429_s2 + $0x20] sm:$0xff]  }
  0x10   :  { %945 = vmatprep.subr.bf16.mxu0 %v1121_v8  ;;  %1038 = vmatpush3.bf16.msra.mxu1 %v1155_v21 }
  0x11   :  { %1039 = vmatprep.subr.bf16.mxu1 %v1156_v22 }
  0x13   :  { %946 = vmatpush3.bf16.msra.mxu0 %v1122_v9  ;;  %v1166_v9 = vld [vmem:[%s1429_s2 + $0x28] sm:$0xff]  }
  0x14   :  { %947 = vmatprep.subr.bf16.mxu0 %v1123_v10  ;;  %1040 = vmatpush3.bf16.msra.mxu1 %v1156_v22 }
  0x15   :  { %1041 = vmatprep.subr.bf16.mxu1 %v1157_v36 }
  0x17   :  { %948 = vmatpush3.bf16.msra.mxu0 %v1124_v12 }
  0x18   :  { %949 = vmatprep.subr.bf16.mxu0 %v1125_v13  ;;  %1042 = vmatpush3.bf16.msra.mxu1 %v1157_v36 }
  0x19   :  { %1043 = vmatprep.subr.bf16.mxu1 %v1158_v37 }
  0x1b   :  { %950 = vmatpush3.bf16.msra.mxu0 %v1126_v14  ;;  %v1167_v14 = vld [vmem:[%s1429_s2 + $0x30] sm:$0xff]  }
  0x1c   :  { %951 = vmatprep.subr.bf16.mxu0 %v1127_v15  ;;  %1044 = vmatpush3.bf16.msra.mxu1 %v1158_v37 }
  0x1d   :  { %1045 = vmatprep.subr.bf16.mxu1 %v1159_v38 }
  0x1f   :  { %952 = vmatpush3.bf16.msra.mxu0 %v1128_v16 }
  0x20   :  { %1046 = vmatpush3.bf16.msra.mxu1 %v1159_v38 }
  0x21   :  { %1047 = vmatprep.subr.bf16.mxu1 %v1160_v39 }
  0x22   :  { %319 = vmatmul.mubr.bf16.vlgmr.msra.gmra.mrb[0].mxu0 %v1129_v18  ;;  %v1168_v18 = vld [vmem:[%s1429_s2 + $0x38] sm:$0xff]  }
  0x23   :  { %326 = vmatprep.mubr.bf16.mxu0 %v1132_v20 }
  0x24   :  { %1048 = vmatpush3.bf16.msra.mxu1 %v1160_v39  ;;  %v1169_v39 = vld [vmem:[%s1426_s1] sm:$0xff]  }
  0x25   :  { %1065 = vmatprep.subr.bf16.mxu1 %v1161_v40 }
  0x2a   :  { %327 = vmatmul.mubr.bf16.gmra.mrb[4].mxu0 %v1134_v23 }
  0x2b   :  { %334 = vmatprep.mubr.bf16.mxu0 %v1135_v24 }
  0x32   :  { %335 = vmatmul.mubr.bf16.gmra.mrb[8].mxu0 %v1137_v25 }
  0x33   :  { %342 = vmatprep.mubr.bf16.mxu0 %v1138_v26 }
  0x3a   :  { %343 = vmatmul.mubr.bf16.gmra.mrb[12].mxu0 %v1140_v27 }
  0x3b   :  { %350 = vmatprep.mubr.bf16.mxu0 %v1141_v28 }
  0x42   :  { %351 = vmatmul.mubr.bf16.gmra.mrb[16].mxu0 %v1143_v29 }
  0x43   :  { %358 = vmatprep.mubr.bf16.mxu0 %v1144_v30 }
  0x4a   :  { %359 = vmatmul.mubr.bf16.gmra.mrb[20].mxu0 %v1146_v31 }
  0x4b   :  { %366 = vmatprep.mubr.bf16.mxu0 %v1147_v32 }
  0x52   :  { %367 = vmatmul.mubr.bf16.gmra.mrb[24].mxu0 %v1149_v33 }
  0x53   :  { %374 = vmatprep.mubr.bf16.mxu0 %v1150_v34 }
  0x5a   :  { %375 = vmatmul.mubr.bf16.gmra.mrb[28].mxu0 %v1152_v35 }
  0xf5   :  { %v953_v41 = vpop.f32.mrb[0].mxu0 }
  0xf6   :  { %v954_v42 = vpop.f32.mrb[1].mxu0 }
  0xf7   :  { %v955_v43 = vadd.f32 %v954_v42, %v953_v41  ;;  %v956_v44 = vpop.f32.mrb[2].mxu0  ;;  %v1170_v41 = vld [vmem:[%s1426_s1 + $0x8] sm:$0xff]   ;;  %v1171_v42 = vld [vmem:[%s1426_s1 + $0x10] sm:$0xff]  }
  0xf8   :  { %v957_v45 = vpop.f32.mrb[3].mxu0 }
  0xf9   :  { %v958_v46 = vadd.f32 %v957_v45, %v956_v44  ;;  %v1173_v44 = vld [vmem:[%s1426_s1 + $0x20] sm:$0xff]   ;;  %v1174_v45 = vld [vmem:[%s1426_s1 + $0x28] sm:$0xff]  }
  0xfb   :  { %v471_v47 = vpack.c.bf16 %v958_v46, %v955_v43  ;;  %v1172_v43 = vld [vmem:[%s1426_s1 + $0x18] sm:$0xff]   ;;  %v1175_v46 = vld [vmem:[%s1426_s1 + $0x30] sm:$0xff]  }
  0xfd   :  { %v959_v48 = vpop.f32.mrb[4].mxu0  ;;  %1049 = vmatprep.mubr.bf16.mxu1 %v471_v47  ;;  %v1176_v47 = vld [vmem:[%s1426_s1 + $0x38] sm:$0xff]  }
  0xfe   :  { %v960_v49 = vpop.f32.mrb[5].mxu0 }
  0xff   :  { %v961_v50 = vadd.f32 %v960_v49, %v959_v48  ;;  %v962_v51 = vpop.f32.mrb[6].mxu0  ;;  %v936_v48 = vld [vmem:[%s1430_s4] ss:$0 sm:$0xff] }
 0x100   :  { %v963_v52 = vpop.f32.mrb[7].mxu0 }
 0x101   :  { %v964_v53 = vadd.f32 %v963_v52, %v962_v51 }
 0x103   :  { %v472_v54 = vpack.c.bf16 %v964_v53, %v961_v50 }
 0x105   :  { %v965_v56 = vpop.f32.mrb[8].mxu0  ;;  %1050 = vmatmul.mubr.bf16.vlgmr.msra.gmra.mrb[0].mxu1 %v472_v54 }
 0x106   :  { %v966_v57 = vpop.f32.mrb[9].mxu0  ;;  %1066 = vmatpush3.bf16.msra.mxu1 %v1161_v40 }
 0x107   :  { %v967_v58 = vadd.f32 %v966_v57, %v965_v56  ;;  %v968_v59 = vpop.f32.mrb[10].mxu0  ;;  %1067 = vmatprep.subr.bf16.mxu1 %v1162_v55 }
 0x108   :  { %v969_v61 = vpop.f32.mrb[11].mxu0 }
 0x109   :  { %v970_v62 = vadd.f32 %v969_v61, %v968_v59 }
 0x10a   :  { %1068 = vmatpush3.bf16.msra.mxu1 %v1162_v55 }
 0x10b   :  { %v473_v63 = vpack.c.bf16 %v970_v62, %v967_v58  ;;  %1069 = vmatprep.subr.bf16.mxu1 %v1163_v60 }
 0x10d   :  { %v971_v1 = vpop.f32.mrb[12].mxu0  ;;  %1053 = vmatprep.mubr.bf16.mxu1 %v473_v63 }
 0x10e   :  { %v972_v2 = vpop.f32.mrb[13].mxu0  ;;  %1070 = vmatpush3.bf16.msra.mxu1 %v1163_v60 }
 0x10f   :  { %v973_v3 = vadd.f32 %v972_v2, %v971_v1  ;;  %v974_v4 = vpop.f32.mrb[14].mxu0  ;;  %1071 = vmatprep.subr.bf16.mxu1 %v1164_v0 }
 0x110   :  { %v975_v6 = vpop.f32.mrb[15].mxu0 }
 0x111   :  { %v976_v7 = vadd.f32 %v975_v6, %v974_v4 }
 0x112   :  { %1072 = vmatpush3.bf16.msra.mxu1 %v1164_v0 }
 0x113   :  { %v474_v8 = vpack.c.bf16 %v976_v7, %v973_v3  ;;  %1073 = vmatprep.subr.bf16.mxu1 %v1165_v5 }
 0x115   :  { %v977_v10 = vpop.f32.mrb[16].mxu0  ;;  %1054 = vmatmul.mubr.bf16.gmra.mrb[4].mxu1 %v474_v8 }
 0x116   :  { %v978_v11 = vpop.f32.mrb[17].mxu0  ;;  %1074 = vmatpush3.bf16.msra.mxu1 %v1165_v5 }
 0x117   :  { %v979_v12 = vadd.f32 %v978_v11, %v977_v10  ;;  %v980_v13 = vpop.f32.mrb[18].mxu0  ;;  %1075 = vmatprep.subr.bf16.mxu1 %v1166_v9 }
 0x118   :  { %v981_v15 = vpop.f32.mrb[19].mxu0 }
 0x119   :  { %v982_v16 = vadd.f32 %v981_v15, %v980_v13 }
 0x11a   :  { %1076 = vmatpush3.bf16.msra.mxu1 %v1166_v9 }
 0x11b   :  { %v475_v17 = vpack.c.bf16 %v982_v16, %v979_v12  ;;  %1077 = vmatprep.subr.bf16.mxu1 %v1167_v14 }
 0x11d   :  { %v983_v19 = vpop.f32.mrb[20].mxu0  ;;  %1057 = vmatprep.mubr.bf16.mxu1 %v475_v17 }
 0x11e   :  { %v984_v20 = vpop.f32.mrb[21].mxu0  ;;  %1078 = vmatpush3.bf16.msra.mxu1 %v1167_v14 }
 0x11f   :  { %v985_v21 = vadd.f32 %v984_v20, %v983_v19  ;;  %v986_v22 = vpop.f32.mrb[22].mxu0  ;;  %1079 = vmatprep.subr.bf16.mxu1 %v1168_v18 }
 0x120   :  { %v987_v23 = vpop.f32.mrb[23].mxu0 }
 0x121   :  { %v988_v24 = vadd.f32 %v987_v23, %v986_v22 }
 0x122   :  { %1080 = vmatpush3.bf16.msra.mxu1 %v1168_v18 }
 0x123   :  { %v476_v25 = vpack.c.bf16 %v988_v24, %v985_v21 }
 0x125   :  { %v989_v26 = vpop.f32.mrb[24].mxu0  ;;  %1058 = vmatmul.mubr.bf16.gmra.mrb[8].mxu1 %v476_v25 }
 0x126   :  { %v990_v27 = vpop.f32.mrb[25].mxu0 }
 0x127   :  { %v991_v28 = vadd.f32 %v990_v27, %v989_v26  ;;  %v992_v29 = vpop.f32.mrb[26].mxu0 }
 0x128   :  { %v993_v30 = vpop.f32.mrb[27].mxu0 }
 0x129   :  { %v994_v31 = vadd.f32 %v993_v30, %v992_v29 }
 0x12b   :  { %v477_v32 = vpack.c.bf16 %v994_v31, %v991_v28 }
 0x12d   :  { %v995_v33 = vpop.f32.mrb[28].mxu0  ;;  %1061 = vmatprep.mubr.bf16.mxu1 %v477_v32 }
 0x12e   :  { %v996_v34 = vpop.f32.mrb[29].mxu0 }
 0x12f   :  { %v997_v35 = vadd.f32 %v996_v34, %v995_v33  ;;  %v998_v36 = vpop.f32.mrb[30].mxu0 }
 0x130   :  { %v999_v37 = vpop.f32.mrb[31].mxu0 }
 0x131   :  { %v1000_v38 = vadd.f32 %v999_v37, %v998_v36 }
 0x133   :  { %v478_v40 = vpack.c.bf16 %v1000_v38, %v997_v35 }
 0x135   :  { %1062 = vmatmul.mubr.bf16.gmra.mrb[12].mxu1 %v478_v40 }
 0x136   :  { %1081 = vmatprep.mubr.bf16.mxu1 %v1169_v39 }
 0x13d   :  { %1082 = vmatmul.mubr.bf16.vlgmr.msra.gmra.mrb[0].mxu1 %v1170_v41 }
 0x13e   :  { %1085 = vmatprep.mubr.bf16.mxu1 %v1171_v42 }
 0x145   :  { %1086 = vmatmul.mubr.bf16.gmra.mrb[4].mxu1 %v1172_v43 }
 0x146   :  { %1089 = vmatprep.mubr.bf16.mxu1 %v1173_v44 }
 0x14d   :  { %1090 = vmatmul.mubr.bf16.gmra.mrb[8].mxu1 %v1174_v45 }
 0x14e   :  { %1093 = vmatprep.mubr.bf16.mxu1 %v1175_v46 }
 0x155   :  { %1094 = vmatmul.mubr.bf16.gmra.mrb[12].mxu1 %v1176_v47 }
 0x210   :  { %v1083_v49 = vpop.f32.mrb[0].mxu1 }
 0x211   :  { %v842_v50 = vadd.f32 %v1083_v49, %v936_v48  ;;  %v770_v51 = vpop.f32.mrb[1].mxu1 }
 0x212   :  { %v840_v52 = vadd.f32 %v936_v48, %v770_v51  ;;  %v1084_v53 = vpop.f32.mrb[2].mxu1 }
 0x213   :  { %858 = vst [vmem:[%s1431_s5 + $0x10] sm:$0xff] %v842_v50  ;;  %v843_v54 = vadd.f32 %v1084_v53, %v936_v48  ;;  %v773_v55 = vpop.f32.mrb[3].mxu1 }
 0x214   :  { %856 = vst [vmem:[%s1431_s5] sm:$0xff] %v840_v52  ;;  %v841_v56 = vadd.f32 %v936_v48, %v773_v55 }
 0x215   :  { %859 = vst [vmem:[%s1431_s5 + $0x18] sm:$0xff] %v843_v54 }
 0x216   :  { %857 = vst [vmem:[%s1431_s5 + $0x8] sm:$0xff] %v841_v56 }
 0x218   :  { %v1087_v57 = vpop.f32.mrb[4].mxu1 }
 0x219   :  { %v846_v58 = vadd.f32 %v1087_v57, %v936_v48  ;;  %v786_v59 = vpop.f32.mrb[5].mxu1 }
 0x21a   :  { %v844_v60 = vadd.f32 %v936_v48, %v786_v59  ;;  %v1088_v61 = vpop.f32.mrb[6].mxu1 }
 0x21b   :  { %862 = vst [vmem:[%s1431_s5 + $0x30] sm:$0xff] %v846_v58  ;;  %v847_v62 = vadd.f32 %v1088_v61, %v936_v48  ;;  %v789_v63 = vpop.f32.mrb[7].mxu1 }
 0x21c   :  { %860 = vst [vmem:[%s1431_s5 + $0x20] sm:$0xff] %v844_v60  ;;  %v845_v0 = vadd.f32 %v936_v48, %v789_v63 }
 0x21d   :  { %863 = vst [vmem:[%s1431_s5 + $0x38] sm:$0xff] %v847_v62 }
 0x21e   :  { %861 = vst [vmem:[%s1431_s5 + $0x28] sm:$0xff] %v845_v0 }
 0x220   :  { %v1091_v1 = vpop.f32.mrb[8].mxu1 }
 0x221   :  { %v850_v2 = vadd.f32 %v1091_v1, %v936_v48  ;;  %v802_v3 = vpop.f32.mrb[9].mxu1 }
 0x222   :  { %v848_v4 = vadd.f32 %v936_v48, %v802_v3  ;;  %v1092_v5 = vpop.f32.mrb[10].mxu1 }
 0x223   :  { %866 = vst [vmem:[%s1431_s5 + $0x50] sm:$0xff] %v850_v2  ;;  %v851_v6 = vadd.f32 %v1092_v5, %v936_v48  ;;  %v805_v7 = vpop.f32.mrb[11].mxu1 }
 0x224   :  { %864 = vst [vmem:[%s1431_s5 + $0x40] sm:$0xff] %v848_v4  ;;  %v849_v8 = vadd.f32 %v936_v48, %v805_v7 }
 0x225   :  { %867 = vst [vmem:[%s1431_s5 + $0x58] sm:$0xff] %v851_v6 }
 0x226   :  { %865 = vst [vmem:[%s1431_s5 + $0x48] sm:$0xff] %v849_v8 }
 0x228   :  { %v1095_v9 = vpop.f32.mrb[12].mxu1 }
 0x229   :  { %v854_v10 = vadd.f32 %v1095_v9, %v936_v48  ;;  %v818_v11 = vpop.f32.mrb[13].mxu1 }
 0x22a   :  { %v852_v12 = vadd.f32 %v936_v48, %v818_v11  ;;  %v1096_v13 = vpop.f32.mrb[14].mxu1 }
 0x22b   :  { %870 = vst [vmem:[%s1431_s5 + $0x70] sm:$0xff] %v854_v10  ;;  %v855_v14 = vadd.f32 %v1096_v13, %v936_v48  ;;  %v821_v15 = vpop.f32.mrb[15].mxu1 }
 0x22c   :  { %868 = vst [vmem:[%s1431_s5 + $0x60] sm:$0xff] %v852_v12  ;;  %v853_v16 = vadd.f32 %v936_v48, %v821_v15 }
 0x22d   :  { %871 = vst [vmem:[%s1431_s5 + $0x78] sm:$0xff] %v855_v14 }
 0x22e   :  { %869 = vst [vmem:[%s1431_s5 + $0x68] sm:$0xff] %v853_v16 }

// kernel: graphsage_forward.2
= control target key start
LH: loop header
LB: loop body
LE: loop exit
PB: predicated region body
PF: predicated region fallthrough
CT: control target
= control target key end

     0   :  { %s2208_s18 = smov 0   ;;  %s2210_s19 = smov 0   ;;  %s2481_s0 = inlined_call_operand.vmem [shape: bf16[256,512], index: 0, kind: input, shape index: {}]   ;;  %s2482_s1 = inlined_call_operand.vmem [shape: bf16[512,128], index: 1, kind: input, shape index: {}]   ;;  %s2483_s2 = inlined_call_operand.vmem [shape: bf16[128,128], index: 2, kind: input, shape index: {}]   ;;  %s2484_s3 = inlined_call_operand.vmem [shape: bf16[128,128], index: 3, kind: input, shape index: {}]   ;;  %s2485_s4 = inlined_call_operand.vmem [shape: f32[1,128], index: 4, kind: input, shape index: {}]   ;;  %s2486_s5 = inlined_call_operand.vmem [shape: bf16[256,128], index: 5, kind: output, shape index: {}]  }
   0x1   :  { %s2212_s20 = smov 0  }
   0x2 LB: > { %s27_s21 = sadd.s32 1, %s2172_s19  ;;  %p1591_p0 = scmp.ge.s32.totalorder %s2176_s20, 1  ;;  %s2176_s20 = sphi %s2212_s20, %s15_s20   ;;  %s2172_s19 = sphi %s2210_s19, %s2488_s19   ;;  %s2168_s18 = sphi %s2208_s18, %s2487_s18  }
   0x3   : > { %p29_p1 = scmp.ge.s32.totalorder %s27_s21, 2  ;;  %p208_p2 = scmp.lt.s32.totalorder %s2176_s20, 3 }
   0x5   : > { %s2490_s21 = smov (%p29_p1, %s27_s21), 0  ;;  %p209_p3 = pnand %p1591_p0, %p208_p2 }
   0x6   : > { %v2050_v0 = vld [vmem:[%s2482_s1 + $0x40] sm:$0xff] (!%p209_p3)   ;;  %s1592_s24 = sshll.u32 (!%p209_p3), %s2168_s18, 4  ;;  %v2052_v2 = vld [vmem:[%s2482_s1 + $0x48] sm:$0xff] (!%p209_p3)   ;;  %v2054_v4 = vld [vmem:[%s2482_s1 + $0x50] sm:$0xff] (!%p209_p3)   ;;  %s1661_s6 = sshll.u32 (!%p209_p3), %s2168_s18, 7 }
   0x7   : > { %212 = sbr.rel (%p209_p3) target bundleno = 602 (0x25a), region = 40  ;;  %v2051_v1 = vld [vmem:[%s2482_s1] sm:$0xff] (!%p209_p3)   ;;  %1994 = vmatprep.subr.bf16.mxu1 (!%p209_p3), %v2050_v0  ;;  %1770 = vmatprep.subr.bf16.mxu0 (!%p209_p3), %v2050_v0  ;;  %v2053_v3 = vld [vmem:[%s2482_s1 + $0x8] sm:$0xff] (!%p209_p3)   ;;  %p243_p4 = scmp.lt.s32.totalorder (!%p209_p3), %s1592_s24, 31  ;;  %v2055_v5 = vld [vmem:[%s2482_s1 + $0x10] sm:$0xff] (!%p209_p3)  }
   0x8   : > { %2002 = vmatpush3.bf16.msra.mxu1 (!%p209_p3), %v2051_v1  ;;  %1771 = vmatpush3.bf16.msra.mxu0 (!%p209_p3), %v2051_v1  ;;  %v2056_v6 = vld [vmem:[%s2482_s1 + $0x58] sm:$0xff] (!%p209_p3)   ;;  %v2058_v8 = vld [vmem:[%s2482_s1 + $0x60] sm:$0xff] (!%p209_p3)   ;;  %v2060_v10 = vld [vmem:[%s2482_s1 + $0x68] sm:$0xff] (!%p209_p3)   ;;  %s979_s7 = sshra.s32 (!%p209_p3), %s1661_s6, 3 }
   0x9   : > { %1995 = vmatprep.subr.bf16.mxu1 (!%p209_p3), %v2052_v2  ;;  %1772 = vmatprep.subr.bf16.mxu0 (!%p209_p3), %v2052_v2  ;;  %v2057_v7 = vld [vmem:[%s2482_s1 + $0x18] sm:$0xff] (!%p209_p3)   ;;  %v2059_v9 = vld [vmem:[%s2482_s1 + $0x20] sm:$0xff] (!%p209_p3)   ;;  %v2061_v12 = vld [vmem:[%s2482_s1 + $0x28] sm:$0xff] (!%p209_p3)   ;;  %s1662_s8 = sshll.u32 (!%p209_p3), %s979_s7, 2 }
   0xa   : > { %v2062_v13 = vld [vmem:[%s2482_s1 + $0x70] sm:$0xff] (!%p209_p3)   ;;  %v2064_v15 = vld [vmem:[%s2482_s1 + $0x78] sm:$0xff] (!%p209_p3)   ;;  %v2069_v17 = vld [vmem:[%s2482_s1 + $0xc0] sm:$0xff] (!%p209_p3)   ;;  %s2399_s11 = scalar_lea.vmem (!%p209_p3), %s2482_s1, %s1662_s8 }
   0xb   : > { %v2063_v14 = vld [vmem:[%s2482_s1 + $0x30] sm:$0xff] (!%p209_p3)   ;;  %v2065_v16 = vld [vmem:[%s2482_s1 + $0x38] sm:$0xff] (!%p209_p3)   ;;  %v2070_v19 = vld [vmem:[%s2482_s1 + $0x80] sm:$0xff] (!%p209_p3)  }
   0xc   : > { %2003 = vmatpush3.bf16.msra.mxu1 (!%p209_p3), %v2053_v3  ;;  %1773 = vmatpush3.bf16.msra.mxu0 (!%p209_p3), %v2053_v3  ;;  %v2071_v21 = vld [vmem:[%s2482_s1 + $0xc8] sm:$0xff] (!%p209_p3)   ;;  %v2076_v24 = vld [vmem:[%s2482_s1 + $0xd0] sm:$0xff] (!%p209_p3)   ;;  %v2078_v28 = vld [vmem:[%s2482_s1 + $0xd8] sm:$0xff] (!%p209_p3)  }
   0xd   : > { %1996 = vmatprep.subr.bf16.mxu1 (!%p209_p3), %v2054_v4  ;;  %1774 = vmatprep.subr.bf16.mxu0 (!%p209_p3), %v2054_v4  ;;  %v2072_v22 = vld [vmem:[%s2482_s1 + $0x88] sm:$0xff] (!%p209_p3)   ;;  %v2077_v25 = vld [vmem:[%s2482_s1 + $0x90] sm:$0xff] (!%p209_p3)   ;;  %v2079_v31 = vld [vmem:[%s2482_s1 + $0x98] sm:$0xff] (!%p209_p3)  }
   0xe   : > { %s2492_s24 = smov (!%p243_p4, %s1592_s24), 31  ;;  %v2083_v33 = vld [vmem:[%s2482_s1 + $0xe0] sm:$0xff]   ;;  %v2085_v38 = vld [vmem:[%s2482_s1 + $0xe8] sm:$0xff]   ;;  %v2090_v40 = vld [vmem:[%s2482_s1 + $0xf0] sm:$0xff]  }
   0xf   : > { %s1706_s14 = sshll.u32 %s2492_s24, 4  ;;  %v2084_v36 = vld [vmem:[%s2482_s1 + $0xa0] sm:$0xff]   ;;  %v2086_v39 = vld [vmem:[%s2482_s1 + $0xa8] sm:$0xff]   ;;  %v2091_v43 = vld [vmem:[%s2482_s1 + $0xb0] sm:$0xff]   ;;  %s1596_s7 = sshll.u32 %s2492_s24, 2 }
  0x10   : > { %2004 = vmatpush3.bf16.msra.mxu1 %v2055_v5  ;;  %1775 = vmatpush3.bf16.msra.mxu0 %v2055_v5  ;;  %s2262_s23 = scalar_lea.vmem %s2481_s0, %s1706_s14  ;;  %v2092_v46 = vld [vmem:[%s2482_s1 + $0xf8] sm:$0xff]   ;;  %v2130_v0 = vld [vmem:[%s2484_s3] sm:$0xff]   ;;  %v2131_v1 = vld [vmem:[%s2484_s3 + $0x8] sm:$0xff]   ;;  %s2462_s10 = scalar_lea.vmem %s2486_s5, %s1596_s7 }
  0x11   : > { %1997 = vmatprep.subr.bf16.mxu1 %v2056_v6  ;;  %1776 = vmatprep.subr.bf16.mxu0 %v2056_v6  ;;  %v2068_v11 = vld [vmem:[%s2262_s23 + $0x84] ss:$16 sps:$4 sm:$0xff]   ;;  %v2066_v18 = vld [vmem:[%s2262_s23 + $0x80] ss:$16 sps:$4 sm:$0xff]   ;;  %v2099_v44 = vld [vmem:[%s2262_s23 + $0xc] ss:$16 sps:$4 sm:$0xff]  }
  0x12   : > { %813 = vmatprep.mubr.bf16.mxu1 %v2068_v11  ;;  %v2073_v20 = vld [vmem:[%s2262_s23 + $0xa4] ss:$16 sps:$4 sm:$0xff]   ;;  %v2075_v23 = vld [vmem:[%s2262_s23 + $0xa0] ss:$16 sps:$4 sm:$0xff]   ;;  %v2093_v47 = vld [vmem:[%s2482_s1 + $0xb8] sm:$0xff]  }
  0x13   : > { %v2094_v26 = vld [vmem:[%s2262_s23] ss:$16 sps:$4 sm:$0xff]   ;;  %v2096_v27 = vld [vmem:[%s2262_s23 + $0x4] ss:$16 sps:$4 sm:$0xff]   ;;  %v2097_v49 = vld [vmem:[%s2262_s23 + $0x8] ss:$16 sps:$4 sm:$0xff]  }
  0x14   : > { %2005 = vmatpush3.bf16.msra.mxu1 %v2057_v7  ;;  %1777 = vmatpush3.bf16.msra.mxu0 %v2057_v7  ;;  %v2080_v29 = vld [vmem:[%s2262_s23 + $0xc4] ss:$16 sps:$4 sm:$0xff]   ;;  %v2082_v32 = vld [vmem:[%s2262_s23 + $0xc0] ss:$16 sps:$4 sm:$0xff]   ;;  %v2102_v50 = vld [vmem:[%s2262_s23 + $0x2c] ss:$16 sps:$4 sm:$0xff]  }
  0x15   : > { %1998 = vmatprep.subr.bf16.mxu1 %v2058_v8  ;;  %1778 = vmatprep.subr.bf16.mxu0 %v2058_v8  ;;  %v2100_v30 = vld [vmem:[%s2262_s23 + $0x24] ss:$16 sps:$4 sm:$0xff]   ;;  %v2104_v34 = vld [vmem:[%s2262_s23 + $0x20] ss:$16 sps:$4 sm:$0xff]   ;;  %v2105_v51 = vld [vmem:[%s2262_s23 + $0x28] ss:$16 sps:$4 sm:$0xff]  }
  0x16   : > { %781 = vmatprep.mubr.bf16.mxu0 %v2096_v27  ;;  %v2106_v35 = vld [vmem:[%s2262_s23 + $0x44] ss:$16 sps:$4 sm:$0xff]   ;;  %v2089_v41 = vld [vmem:[%s2262_s23 + $0xe0] ss:$16 sps:$4 sm:$0xff]   ;;  %v2108_v52 = vld [vmem:[%s2262_s23 + $0x4c] ss:$16 sps:$4 sm:$0xff]  }
  0x17   : > { %v2087_v37 = vld [vmem:[%s2262_s23 + $0xe4] ss:$16 sps:$4 sm:$0xff]   ;;  %v2110_v42 = vld [vmem:[%s2262_s23 + $0x40] ss:$16 sps:$4 sm:$0xff]   ;;  %v2111_v53 = vld [vmem:[%s2262_s23 + $0x48] ss:$16 sps:$4 sm:$0xff]  }
  0x18   : > { %2006 = vmatpush3.bf16.msra.mxu1 %v2059_v9  ;;  %1779 = vmatpush3.bf16.msra.mxu0 %v2059_v9  ;;  %v2112_v45 = vld [vmem:[%s2262_s23 + $0x64] ss:$16 sps:$4 sm:$0xff]   ;;  %v2116_v48 = vld [vmem:[%s2262_s23 + $0x60] ss:$16 sps:$4 sm:$0xff]   ;;  %v2114_v54 = vld [vmem:[%s2262_s23 + $0x6c] ss:$16 sps:$4 sm:$0xff]  }
  0x19   : > { %1999 = vmatprep.subr.bf16.mxu1 %v2060_v10  ;;  %1780 = vmatprep.subr.bf16.mxu0 %v2060_v10  ;;  %v2117_v55 = vld [vmem:[%s2262_s23 + $0x68] ss:$16 sps:$4 sm:$0xff]   ;;  %v2118_v56 = vld [vmem:[%s2262_s23 + $0x8c] ss:$16 sps:$4 sm:$0xff]   ;;  %v2132_v2 = vld [vmem:[%s2484_s3 + $0x10] sm:$0xff]  }
  0x1a   : > { %v2120_v57 = vld [vmem:[%s2262_s23 + $0x88] ss:$16 sps:$4 sm:$0xff]   ;;  %v2121_v58 = vld [vmem:[%s2262_s23 + $0xac] ss:$16 sps:$4 sm:$0xff]   ;;  %v2134_v4 = vld [vmem:[%s2484_s3 + $0x20] sm:$0xff]  }
  0x1b   : > { %v2123_v59 = vld [vmem:[%s2262_s23 + $0xa8] ss:$16 sps:$4 sm:$0xff]   ;;  %v2124_v60 = vld [vmem:[%s2262_s23 + $0xcc] ss:$16 sps:$4 sm:$0xff]   ;;  %v2136_v6 = vld [vmem:[%s2484_s3 + $0x30] sm:$0xff]  }
  0x1c   : > { %2007 = vmatpush3.bf16.msra.mxu1 %v2061_v12  ;;  %1781 = vmatpush3.bf16.msra.mxu0 %v2061_v12  ;;  %v2126_v61 = vld [vmem:[%s2262_s23 + $0xc8] ss:$16 sps:$4 sm:$0xff]   ;;  %v2127_v62 = vld [vmem:[%s2262_s23 + $0xec] ss:$16 sps:$4 sm:$0xff]   ;;  %v2392_v8 = vld [vmem:[%s2483_s2] sm:$0xff]  }
  0x1d   : > { %2000 = vmatprep.subr.bf16.mxu1 %v2062_v13  ;;  %1782 = vmatprep.subr.bf16.mxu0 %v2062_v13  ;;  %v2129_v63 = vld [vmem:[%s2262_s23 + $0xe8] ss:$16 sps:$4 sm:$0xff]  }
  0x1e   : > { %v2133_v3 = vld [vmem:[%s2484_s3 + $0x18] sm:$0xff]   ;;  %v2135_v5 = vld [vmem:[%s2484_s3 + $0x28] sm:$0xff]  }
  0x1f   : > { %v2137_v7 = vld [vmem:[%s2484_s3 + $0x38] sm:$0xff]  }
  0x20   : > { %2008 = vmatpush3.bf16.msra.mxu1 %v2063_v14  ;;  %1783 = vmatpush3.bf16.msra.mxu0 %v2063_v14 }
  0x21   : > { %2001 = vmatprep.subr.bf16.mxu1 %v2064_v15  ;;  %1784 = vmatprep.subr.bf16.mxu0 %v2064_v15 }
  0x24   : > { %2009 = vmatpush3.bf16.msra.mxu1 %v2065_v16  ;;  %1785 = vmatpush3.bf16.msra.mxu0 %v2065_v16 }
  0x25   : > { %1834 = vmatprep.subr.bf16.mxu1 %v2069_v17  ;;  %1930 = vmatprep.subr.bf16.mxu0 %v2130_v0 }
  0x27   : > { %814 = vmatmul.mubr.bf16.vlgmr.msra.gmra.mrb[0].mxu1 %v2066_v18  ;;  %782 = vmatmul.mubr.bf16.vlgmr.msra.gmra.mrb[0].mxu0 %v2094_v26 }
  0x28   : > { %1835 = vmatpush3.bf16.msra.mxu1 %v2070_v19  ;;  %821 = vmatprep.mubr.bf16.mxu1 %v2073_v20 }
  0x29   : > { %1836 = vmatprep.subr.bf16.mxu1 %v2071_v21  ;;  %789 = vmatprep.mubr.bf16.mxu0 %v2100_v30 }
  0x2a   : > { %1931 = vmatpush3.bf16.msra.mxu0 %v2130_v0 }
  0x2b   : > { %1932 = vmatprep.subr.bf16.mxu0 %v2131_v1 }
  0x2c   : > { %1837 = vmatpush3.bf16.msra.mxu1 %v2072_v22 }
  0x2d   : > { %1838 = vmatprep.subr.bf16.mxu1 %v2076_v24 }
  0x2e   : > { %1933 = vmatpush3.bf16.msra.mxu0 %v2131_v1 }
  0x2f   : > { %822 = vmatmul.mubr.bf16.gmra.mrb[4].mxu1 %v2075_v23  ;;  %790 = vmatmul.mubr.bf16.gmra.mrb[4].mxu0 %v2104_v34 }
  0x30   : > { %1839 = vmatpush3.bf16.msra.mxu1 %v2077_v25  ;;  %829 = vmatprep.mubr.bf16.mxu1 %v2080_v29 }
  0x31   : > { %1840 = vmatprep.subr.bf16.mxu1 %v2078_v28  ;;  %797 = vmatprep.mubr.bf16.mxu0 %v2106_v35 }
  0x32   : > { %1934 = vmatprep.subr.bf16.mxu0 %v2132_v2 }
  0x33   : > { %1935 = vmatpush3.bf16.msra.mxu0 %v2132_v2 }
  0x34   : > { %1841 = vmatpush3.bf16.msra.mxu1 %v2079_v31  ;;  %1936 = vmatprep.subr.bf16.mxu0 %v2133_v3 }
  0x35   : > { %1842 = vmatprep.subr.bf16.mxu1 %v2083_v33 }
  0x37   : > { %830 = vmatmul.mubr.bf16.gmra.mrb[8].mxu1 %v2082_v32  ;;  %798 = vmatmul.mubr.bf16.gmra.mrb[8].mxu0 %v2110_v42 }
  0x38   : > { %1843 = vmatpush3.bf16.msra.mxu1 %v2084_v36  ;;  %837 = vmatprep.mubr.bf16.mxu1 %v2087_v37 }
  0x39   : > { %1844 = vmatprep.subr.bf16.mxu1 %v2085_v38  ;;  %805 = vmatprep.mubr.bf16.mxu0 %v2112_v45 }
  0x3a   : > { %1937 = vmatpush3.bf16.msra.mxu0 %v2133_v3 }
  0x3b   : > { %1938 = vmatprep.subr.bf16.mxu0 %v2134_v4 }
  0x3c   : > { %1845 = vmatpush3.bf16.msra.mxu1 %v2086_v39 }
  0x3d   : > { %1846 = vmatprep.subr.bf16.mxu1 %v2090_v40 }
  0x3e   : > { %1939 = vmatpush3.bf16.msra.mxu0 %v2134_v4 }
  0x3f   : > { %838 = vmatmul.mubr.bf16.gmra.mrb[12].mxu1 %v2089_v41  ;;  %806 = vmatmul.mubr.bf16.gmra.mrb[12].mxu0 %v2116_v48 }
  0x40   : > { %1847 = vmatpush3.bf16.msra.mxu1 %v2091_v43  ;;  %878 = vmatprep.mubr.bf16.mxu1 %v2099_v44 }
  0x41   : > { %1848 = vmatprep.subr.bf16.mxu1 %v2092_v46  ;;  %1940 = vmatprep.subr.bf16.mxu0 %v2135_v5 }
  0x42   : > { %1941 = vmatpush3.bf16.msra.mxu0 %v2135_v5 }
  0x43   : > { %1942 = vmatprep.subr.bf16.mxu0 %v2136_v6 }
  0x44   : > { %1849 = vmatpush3.bf16.msra.mxu1 %v2093_v47 }
  0x46   : > { %1943 = vmatpush3.bf16.msra.mxu0 %v2136_v6 }
  0x47   : > { %879 = vmatmul.mubr.bf16.vlgmr.msra.gmra.mrb[16].mxu1 %v2097_v49  ;;  %1944 = vmatprep.subr.bf16.mxu0 %v2137_v7 }
  0x48   : > { %886 = vmatprep.mubr.bf16.mxu1 %v2102_v50 }
  0x4a   : > { %1945 = vmatpush3.bf16.msra.mxu0 %v2137_v7 }
  0x4b   : > { %1962 = vmatprep.subr.bf16.mxu0 %v2392_v8 }
  0x4f   : > { %887 = vmatmul.mubr.bf16.gmra.mrb[20].mxu1 %v2105_v51 }
  0x50   : > { %894 = vmatprep.mubr.bf16.mxu1 %v2108_v52 }
  0x57   : > { %895 = vmatmul.mubr.bf16.gmra.mrb[24].mxu1 %v2111_v53 }
  0x58   : > { %902 = vmatprep.mubr.bf16.mxu1 %v2114_v54 }
  0x5f   : > { %903 = vmatmul.mubr.bf16.gmra.mrb[28].mxu1 %v2117_v55 }
  0x60   : > { %910 = vmatprep.mubr.bf16.mxu1 %v2118_v56 }
  0x67   : > { %911 = vmatmul.mubr.bf16.gmra.mrb[32].mxu1 %v2120_v57 }
  0x68   : > { %918 = vmatprep.mubr.bf16.mxu1 %v2121_v58 }
  0x6f   : > { %919 = vmatmul.mubr.bf16.gmra.mrb[36].mxu1 %v2123_v59 }
  0x70   : > { %926 = vmatprep.mubr.bf16.mxu1 %v2124_v60 }
  0x77   : > { %927 = vmatmul.mubr.bf16.gmra.mrb[40].mxu1 %v2126_v61 }
  0x78   : > { %934 = vmatprep.mubr.bf16.mxu1 %v2127_v62 }
  0x7f   : > { %935 = vmatmul.mubr.bf16.gmra.mrb[44].mxu1 %v2129_v63 }
  0xfa   : > { %v1810_v9 = vpop.f32.mrb[0].mxu1  ;;  %v1786_v15 = vpop.f32.mrb[0].mxu0 }
  0xfb   : > { %v1811_v10 = vpop.f32.mrb[1].mxu1  ;;  %v1787_v17 = vpop.f32.mrb[1].mxu0 }
  0xfc   : > { %v2401_v11 = vadd.f32 %v1811_v10, %v1810_v9  ;;  %v1813_v12 = vpop.f32.mrb[2].mxu1  ;;  %v1788_v19 = vadd.f32 %v1787_v17, %v1786_v15  ;;  %v1789_v20 = vpop.f32.mrb[2].mxu0  ;;  %v2139_v15 = vld [vmem:[%s2483_s2 + $0x8] sm:$0xff]  }
  0xfd   : > { %v1814_v13 = vpop.f32.mrb[3].mxu1  ;;  %v1790_v23 = vpop.f32.mrb[3].mxu0 }
  0xfe   : > { %v2403_v14 = vadd.f32 %v1814_v13, %v1813_v12  ;;  %v1791_v25 = vadd.f32 %v1790_v23, %v1789_v20  ;;  %v2140_v23 = vld [vmem:[%s2483_s2 + $0x10] sm:$0xff]  }
 0x102   : > { %v1816_v16 = vpop.f32.mrb[4].mxu1  ;;  %v1792_v27 = vpop.f32.mrb[4].mxu0 }
 0x103   : > { %v1817_v18 = vpop.f32.mrb[5].mxu1  ;;  %v1793_v29 = vpop.f32.mrb[5].mxu0 }
 0x104   : > { %v2405_v21 = vadd.f32 %v1817_v18, %v1816_v16  ;;  %v1819_v22 = vpop.f32.mrb[6].mxu1  ;;  %v1794_v31 = vadd.f32 %v1793_v29, %v1792_v27  ;;  %v1795_v32 = vpop.f32.mrb[6].mxu0 }
 0x105   : > { %v1820_v24 = vpop.f32.mrb[7].mxu1  ;;  %v1796_v35 = vpop.f32.mrb[7].mxu0 }
 0x106   : > { %v2407_v26 = vadd.f32 %v1820_v24, %v1819_v22  ;;  %v1797_v37 = vadd.f32 %v1796_v35, %v1795_v32  ;;  %v2142_v35 = vld [vmem:[%s2483_s2 + $0x20] sm:$0xff]  }
 0x10a   : > { %v1822_v28 = vpop.f32.mrb[8].mxu1  ;;  %v1798_v39 = vpop.f32.mrb[8].mxu0 }
 0x10b   : > { %v1823_v30 = vpop.f32.mrb[9].mxu1  ;;  %v1799_v41 = vpop.f32.mrb[9].mxu0 }
 0x10c   : > { %v2409_v33 = vadd.f32 %v1823_v30, %v1822_v28  ;;  %v1825_v34 = vpop.f32.mrb[10].mxu1  ;;  %v1800_v43 = vadd.f32 %v1799_v41, %v1798_v39  ;;  %v1801_v44 = vpop.f32.mrb[10].mxu0  ;;  %v2141_v28 = vld [vmem:[%s2483_s2 + $0x18] sm:$0xff]  }
 0x10d   : > { %v1826_v36 = vpop.f32.mrb[11].mxu1  ;;  %v1802_v47 = vpop.f32.mrb[11].mxu0 }
 0x10e   : > { %v2411_v38 = vadd.f32 %v1826_v36, %v1825_v34  ;;  %v1803_v49 = vadd.f32 %v1802_v47, %v1801_v44 }
 0x112   : > { %v1828_v40 = vpop.f32.mrb[12].mxu1  ;;  %v1804_v51 = vpop.f32.mrb[12].mxu0 }
 0x113   : > { %v1829_v42 = vpop.f32.mrb[13].mxu1  ;;  %v1805_v53 = vpop.f32.mrb[13].mxu0 }
 0x114   : > { %v2413_v45 = vadd.f32 %v1829_v42, %v1828_v40  ;;  %v1831_v46 = vpop.f32.mrb[14].mxu1  ;;  %v1806_v55 = vadd.f32 %v1805_v53, %v1804_v51  ;;  %v1807_v56 = vpop.f32.mrb[14].mxu0  ;;  %v2143_v40 = vld [vmem:[%s2483_s2 + $0x28] sm:$0xff]   ;;  %v2145_v53 = vld [vmem:[%s2483_s2 + $0x38] sm:$0xff]  }
 0x115   : > { %v1832_v48 = vpop.f32.mrb[15].mxu1  ;;  %v1808_v59 = vpop.f32.mrb[15].mxu0 }
 0x116   : > { %v2415_v50 = vadd.f32 %v1832_v48, %v1831_v46  ;;  %v1809_v61 = vadd.f32 %v1808_v59, %v1807_v56  ;;  %v2144_v48 = vld [vmem:[%s2483_s2 + $0x30] sm:$0xff]  }
 0x11a   : > { %v1850_v52 = vpop.f32.mrb[16].mxu1 }
 0x11b   : > { %v1851_v54 = vpop.f32.mrb[17].mxu1 }
 0x11c   : > { %v1852_v57 = vadd.f32 %v1851_v54, %v1850_v52  ;;  %v1853_v58 = vpop.f32.mrb[18].mxu1 }
 0x11d   : > { %v1854_v60 = vpop.f32.mrb[19].mxu1 }
 0x11e   : > { %v881_v62 = vadd.f32 %v1852_v57, %v1788_v19  ;;  %v1855_v63 = vadd.f32 %v1854_v60, %v1853_v58 }
 0x120   : > { %v884_v0 = vadd.f32 %v1855_v63, %v1791_v25 }
 0x122   : > { %v1856_v1 = vpop.f32.mrb[20].mxu1  ;;  %v1031_v2 = vpack.c.bf16 %v884_v0, %v881_v62 }
 0x123   : > { %v1857_v3 = vpop.f32.mrb[21].mxu1 }
 0x124   : > { %v1858_v4 = vadd.f32 %v1857_v3, %v1856_v1  ;;  %v1859_v5 = vpop.f32.mrb[22].mxu1  ;;  %1946 = vmatprep.mubr.bf16.mxu0 %v1031_v2 }
 0x125   : > { %v1860_v6 = vpop.f32.mrb[23].mxu1 }
 0x126   : > { %v889_v7 = vadd.f32 %v1858_v4, %v1794_v31  ;;  %v1861_v9 = vadd.f32 %v1860_v6, %v1859_v5 }
 0x128   : > { %v892_v10 = vadd.f32 %v1861_v9, %v1797_v37 }
 0x12a   : > { %v1032_v12 = vpack.c.bf16 %v892_v10, %v889_v7  ;;  %v1862_v13 = vpop.f32.mrb[24].mxu1 }
 0x12b   : > { %v1863_v16 = vpop.f32.mrb[25].mxu1 }
 0x12c   : > { %v1864_v17 = vadd.f32 %v1863_v16, %v1862_v13  ;;  %v1865_v18 = vpop.f32.mrb[26].mxu1  ;;  %1947 = vmatmul.mubr.bf16.vlgmr.msra.gmra.mrb[16].mxu0 %v1032_v12  ;;  %v2146_v12 = vld [vmem:[%s2399_s11] sm:$0xff]   ;;  %v2147_v13 = vld [vmem:[%s2399_s11 + $0x8] sm:$0xff]   ;;  %v2149_v16 = vld [vmem:[%s2399_s11 + $0x18] sm:$0xff]  }
 0x12d   : > { %v1866_v19 = vpop.f32.mrb[27].mxu1  ;;  %1963 = vmatpush3.bf16.msra.mxu0 %v2392_v8 }
 0x12e   : > { %v897_v20 = vadd.f32 %v1864_v17, %v1800_v43  ;;  %v1867_v22 = vadd.f32 %v1866_v19, %v1865_v18  ;;  %1964 = vmatprep.subr.bf16.mxu0 %v2139_v15  ;;  %v2150_v17 = vld [vmem:[%s2399_s11 + $0x20] sm:$0xff]   ;;  %v2151_v18 = vld [vmem:[%s2399_s11 + $0x28] sm:$0xff]   ;;  %v2153_v19 = vld [vmem:[%s2399_s11 + $0x38] sm:$0xff]  }
 0x130   : > { %v900_v24 = vadd.f32 %v1867_v22, %v1803_v49 }
 0x131   : > { %1965 = vmatpush3.bf16.msra.mxu0 %v2139_v15  ;;  %v2148_v15 = vld [vmem:[%s2399_s11 + $0x10] sm:$0xff]  }
 0x132   : > { %v1868_v25 = vpop.f32.mrb[28].mxu1  ;;  %v1033_v27 = vpack.c.bf16 %v900_v24, %v897_v20  ;;  %1966 = vmatprep.subr.bf16.mxu0 %v2140_v23 }
 0x133   : > { %v1869_v29 = vpop.f32.mrb[29].mxu1 }
 0x134   : > { %v1870_v30 = vadd.f32 %v1869_v29, %v1868_v25  ;;  %v1871_v31 = vpop.f32.mrb[30].mxu1  ;;  %1950 = vmatprep.mubr.bf16.mxu0 %v1033_v27 }
 0x135   : > { %v1872_v8 = vpop.f32.mrb[31].mxu1  ;;  %1967 = vmatpush3.bf16.msra.mxu0 %v2140_v23 }
 0x136   : > { %v905_v32 = vadd.f32 %v1870_v30, %v1806_v55  ;;  %v1873_v34 = vadd.f32 %v1872_v8, %v1871_v31  ;;  %1968 = vmatprep.subr.bf16.mxu0 %v2141_v28 }
 0x138   : > { %v908_v36 = vadd.f32 %v1873_v34, %v1809_v61 }
 0x139   : > { %1969 = vmatpush3.bf16.msra.mxu0 %v2141_v28 }
 0x13a   : > { %v1874_v37 = vpop.f32.mrb[32].mxu1  ;;  %v1034_v39 = vpack.c.bf16 %v908_v36, %v905_v32  ;;  %1970 = vmatprep.subr.bf16.mxu0 %v2142_v35 }
 0x13b   : > { %v1875_v41 = vpop.f32.mrb[33].mxu1 }
 0x13c   : > { %v1876_v42 = vadd.f32 %v1875_v41, %v1874_v37  ;;  %v1877_v43 = vpop.f32.mrb[34].mxu1  ;;  %1951 = vmatmul.mubr.bf16.gmra.mrb[20].mxu0 %v1034_v39 }
 0x13d   : > { %v1878_v44 = vpop.f32.mrb[35].mxu1  ;;  %1971 = vmatpush3.bf16.msra.mxu0 %v2142_v35 }
 0x13e   : > { %v913_v46 = vadd.f32 %v1876_v42, %v2401_v11  ;;  %v1879_v47 = vadd.f32 %v1878_v44, %v1877_v43  ;;  %1972 = vmatprep.subr.bf16.mxu0 %v2143_v40 }
 0x140   : > { %v916_v49 = vadd.f32 %v1879_v47, %v2403_v14 }
 0x141   : > { %1973 = vmatpush3.bf16.msra.mxu0 %v2143_v40 }
 0x142   : > { %v1880_v51 = vpop.f32.mrb[36].mxu1  ;;  %v1035_v52 = vpack.c.bf16 %v916_v49, %v913_v46  ;;  %1974 = vmatprep.subr.bf16.mxu0 %v2144_v48 }
 0x143   : > { %v1881_v54 = vpop.f32.mrb[37].mxu1 }
 0x144   : > { %v1882_v55 = vadd.f32 %v1881_v54, %v1880_v51  ;;  %v1883_v56 = vpop.f32.mrb[38].mxu1  ;;  %1954 = vmatprep.mubr.bf16.mxu0 %v1035_v52 }
 0x145   : > { %v1884_v11 = vpop.f32.mrb[39].mxu1  ;;  %1975 = vmatpush3.bf16.msra.mxu0 %v2144_v48 }
 0x146   : > { %v921_v57 = vadd.f32 %v1882_v55, %v2405_v21  ;;  %v1885_v58 = vadd.f32 %v1884_v11, %v1883_v56  ;;  %1976 = vmatprep.subr.bf16.mxu0 %v2145_v53 }
 0x148   : > { %v924_v14 = vadd.f32 %v1885_v58, %v2407_v26 }
 0x149   : > { %1977 = vmatpush3.bf16.msra.mxu0 %v2145_v53 }
 0x14a   : > { %v1886_v59 = vpop.f32.mrb[40].mxu1  ;;  %v1036_v60 = vpack.c.bf16 %v924_v14, %v921_v57 }
 0x14b   : > { %v1887_v61 = vpop.f32.mrb[41].mxu1 }
 0x14c   : > { %v1888_v62 = vadd.f32 %v1887_v61, %v1886_v59  ;;  %v1889_v63 = vpop.f32.mrb[42].mxu1  ;;  %1955 = vmatmul.mubr.bf16.gmra.mrb[24].mxu0 %v1036_v60 }
 0x14d   : > { %v1890_v0 = vpop.f32.mrb[43].mxu1 }
 0x14e   : > { %v929_v1 = vadd.f32 %v1888_v62, %v2409_v33  ;;  %v1891_v2 = vadd.f32 %v1890_v0, %v1889_v63 }
 0x150   : > { %v932_v3 = vadd.f32 %v1891_v2, %v2411_v38 }
 0x152   : > { %v1892_v21 = vpop.f32.mrb[44].mxu1  ;;  %v1037_v4 = vpack.c.bf16 %v932_v3, %v929_v1 }
 0x153   : > { %v1893_v5 = vpop.f32.mrb[45].mxu1 }
 0x154   : > { %v1894_v26 = vadd.f32 %v1893_v5, %v1892_v21  ;;  %v1895_v6 = vpop.f32.mrb[46].mxu1  ;;  %1958 = vmatprep.mubr.bf16.mxu0 %v1037_v4 }
 0x155   : > { %v1896_v7 = vpop.f32.mrb[47].mxu1 }
 0x156   : > { %v937_v9 = vadd.f32 %v1894_v26, %v2413_v45  ;;  %v1897_v10 = vadd.f32 %v1896_v7, %v1895_v6  ;;  %v2152_v45 = vld [vmem:[%s2399_s11 + $0x30] sm:$0xff]  }
 0x158   : > { %v940_v33 = vadd.f32 %v1897_v10, %v2415_v50  ;;  %v1687_v50 = vld [vmem:[%s2485_s4] ss:$0 sm:$0xff] }
 0x15a   : > { %v1038_v38 = vpack.c.bf16 %v940_v33, %v937_v9 }
 0x15c   : > { %1959 = vmatmul.mubr.bf16.gmra.mrb[28].mxu0 %v1038_v38 }
 0x15d   : > { %1978 = vmatprep.mubr.bf16.mxu0 %v2146_v12 }
 0x164   : > { %1979 = vmatmul.mubr.bf16.vlgmr.msra.gmra.mrb[16].mxu0 %v2147_v13 }
 0x165   : > { %1982 = vmatprep.mubr.bf16.mxu0 %v2148_v15 }
 0x16c   : > { %1983 = vmatmul.mubr.bf16.gmra.mrb[20].mxu0 %v2149_v16 }
 0x16d   : > { %1986 = vmatprep.mubr.bf16.mxu0 %v2150_v17 }
 0x174   : > { %1987 = vmatmul.mubr.bf16.gmra.mrb[24].mxu0 %v2151_v18 }
 0x175   : > { %1990 = vmatprep.mubr.bf16.mxu0 %v2152_v45 }
 0x17c   : > { %1991 = vmatmul.mubr.bf16.gmra.mrb[28].mxu0 %v2153_v19 }
 0x237   : > { %v1980_v20 = vpop.f32.mrb[16].mxu0 }
 0x238   : > { %v1402_v22 = vadd.f32 %v1980_v20, %v1687_v50  ;;  %v1330_v23 = vpop.f32.mrb[17].mxu0 }
 0x239   : > { %v1400_v24 = vadd.f32 %v1687_v50, %v1330_v23  ;;  %v1981_v25 = vpop.f32.mrb[18].mxu0 }
 0x23a   : > { %v1403_v27 = vadd.f32 %v1981_v25, %v1687_v50  ;;  %v1333_v28 = vpop.f32.mrb[19].mxu0  ;;  %v1418_v30 = vmax.f32 %v1402_v22, 0.0 }
 0x23b   : > { %v1401_v29 = vadd.f32 %v1687_v50, %v1333_v28  ;;  %v1416_v8 = vmax.f32 %v1400_v24, 0.0 }
 0x23c   : > { %v1419_v31 = vmax.f32 %v1403_v27, 0.0 }
 0x23d   : > { %v1417_v32 = vmax.f32 %v1401_v29, 0.0 }
 0x23e   : > { %v1731_v34 = vpack.c.bf16 %v1419_v31, %v1418_v30 }
 0x23f   : > { %v1726_v35 = vpack.c.bf16 %v1417_v32, %v1416_v8  ;;  %v1984_v36 = vpop.f32.mrb[20].mxu0 }
 0x240   : > { %1763 = vst [vmem:[%s2462_s10 + $0x8] sm:$0xff] %v1731_v34   ;;  %v1406_v37 = vadd.f32 %v1984_v36, %v1687_v50  ;;  %v1346_v39 = vpop.f32.mrb[21].mxu0 }
 0x241   : > { %1727 = vst [vmem:[%s2462_s10] sm:$0xff] %v1726_v35   ;;  %v1404_v40 = vadd.f32 %v1687_v50, %v1346_v39  ;;  %v1985_v41 = vpop.f32.mrb[22].mxu0 }
 0x242   : > { %v1407_v42 = vadd.f32 %v1985_v41, %v1687_v50  ;;  %v1349_v43 = vpop.f32.mrb[23].mxu0  ;;  %v1422_v46 = vmax.f32 %v1406_v37, 0.0 }
 0x243   : > { %v1405_v44 = vadd.f32 %v1687_v50, %v1349_v43  ;;  %v1420_v48 = vmax.f32 %v1404_v40, 0.0 }
 0x244   : > { %v1423_v47 = vmax.f32 %v1407_v42, 0.0 }
 0x245   : > { %v1421_v49 = vmax.f32 %v1405_v44, 0.0 }
 0x246   : > { %v1741_v51 = vpack.c.bf16 %v1423_v47, %v1422_v46 }
 0x247   : > { %v1736_v52 = vpack.c.bf16 %v1421_v49, %v1420_v48  ;;  %v1988_v53 = vpop.f32.mrb[24].mxu0 }
 0x248   : > { %1765 = vst [vmem:[%s2462_s10 + $0x18] sm:$0xff] %v1741_v51   ;;  %v1410_v54 = vadd.f32 %v1988_v53, %v1687_v50  ;;  %v1362_v55 = vpop.f32.mrb[25].mxu0 }
 0x249   : > { %1764 = vst [vmem:[%s2462_s10 + $0x10] sm:$0xff] %v1736_v52   ;;  %v1408_v56 = vadd.f32 %v1687_v50, %v1362_v55  ;;  %v1989_v11 = vpop.f32.mrb[26].mxu0 }
 0x24a   : > { %v1411_v57 = vadd.f32 %v1989_v11, %v1687_v50  ;;  %v1365_v58 = vpop.f32.mrb[27].mxu0  ;;  %v1426_v59 = vmax.f32 %v1410_v54, 0.0 }
 0x24b   : > { %v1409_v14 = vadd.f32 %v1687_v50, %v1365_v58  ;;  %v1424_v61 = vmax.f32 %v1408_v56, 0.0 }
 0x24c   : > { %v1427_v60 = vmax.f32 %v1411_v57, 0.0 }
 0x24d   : > { %v1425_v62 = vmax.f32 %v1409_v14, 0.0 }
 0x24e   : > { %v1751_v63 = vpack.c.bf16 %v1427_v60, %v1426_v59 }
 0x24f   : > { %v1746_v0 = vpack.c.bf16 %v1425_v62, %v1424_v61  ;;  %v1992_v1 = vpop.f32.mrb[28].mxu0 }
 0x250   : > { %1767 = vst [vmem:[%s2462_s10 + $0x28] sm:$0xff] %v1751_v63   ;;  %v1414_v2 = vadd.f32 %v1992_v1, %v1687_v50  ;;  %v1378_v3 = vpop.f32.mrb[29].mxu0 }
 0x251   : > { %1766 = vst [vmem:[%s2462_s10 + $0x20] sm:$0xff] %v1746_v0   ;;  %v1412_v21 = vadd.f32 %v1687_v50, %v1378_v3  ;;  %v1993_v4 = vpop.f32.mrb[30].mxu0 }
 0x252   : > { %v1415_v5 = vadd.f32 %v1993_v4, %v1687_v50  ;;  %v1381_v26 = vpop.f32.mrb[31].mxu0  ;;  %v1430_v7 = vmax.f32 %v1414_v2, 0.0 }
 0x253   : > { %v1413_v6 = vadd.f32 %v1687_v50, %v1381_v26  ;;  %v1428_v10 = vmax.f32 %v1412_v21, 0.0 }
 0x254   : > { %v1431_v9 = vmax.f32 %v1415_v5, 0.0 }
 0x255   : > { %v1429_v33 = vmax.f32 %v1413_v6, 0.0 }
 0x256   : > { %v1761_v12 = vpack.c.bf16 %v1431_v9, %v1430_v7 }
 0x257   : > { %v1756_v38 = vpack.c.bf16 %v1429_v33, %v1428_v10 }
 0x258   : > { %1769 = vst [vmem:[%s2462_s10 + $0x38] sm:$0xff] %v1761_v12  }
 0x259   : > { %1768 = vst [vmem:[%s2462_s10 + $0x30] sm:$0xff] %v1756_v38  }
 0x25a PF: > { %s15_s20 = sadd.s32 1, %s2176_s20   ;;  %s2487_s18 = smov %s2172_s19 }
 0x25b   : > { %p12_p5 = scmp.ge.s32.totalorder %s15_s20, 4   ;;  %s2488_s19 = smov %s2490_s21 }
 0x25d   :  { %14 = sbr.rel (!%p12_p5) target bundleno = 2 (0x2), region = 80 }

</bundles_post_ra>
